<compile_context>
chip_gen: v5e
topology: v5e:2x2
jax: 0.10.0
libtpu: 0.0.40
codegen_flags: <defaults>
</compile_context>

<pallas_src>
import functools

import jax
import jax.numpy as jnp
from jax.experimental import pallas as pl
from jax.experimental.pallas import tpu as pltpu

_LANE = 128     # lane width (last dim)
_SUBLANE = 8    # f32 sublane count (second-to-last dim)
_NEG_BIG = -1e30  # finite "minus infinity" for padded logit columns (avoids inf/NaN propagation)


def _round_up(n, m):
    return ((n + m - 1) // m) * m


def _pad_to(a, shape, value=0.0):
    pads = [(0, t - s) for s, t in zip(a.shape, shape)]
    if all(p == (0, 0) for p in pads):
        return a
    return jnp.pad(a, pads, constant_values=value)


def _mlp_kernel(x_ref, w1_ref, b1_ref, w2_ref, b2_ref, w3_ref, b3_ref, o_ref):
    """Fused fc1->relu->fc2->relu->fc3->log_softmax on one batch tile.

    All hidden/output feature dims are lane-padded (zero weights / zero biases), which is exact
    for matmul+relu.  b3's padded columns hold -1e30 (with zero w3 columns), so the padded logits
    are exactly -1e30 and the stable log_softmax over the real columns is unaffected.
    """
    x = x_ref[...]

    h1 = jnp.dot(x, w1_ref[...], preferred_element_type=jnp.float32) + b1_ref[...]
    h1 = jnp.maximum(h1, 0.0)

    h2 = jnp.dot(h1, w2_ref[...], preferred_element_type=jnp.float32) + b2_ref[...]
    h2 = jnp.maximum(h2, 0.0)

    logits = jnp.dot(h2, w3_ref[...], preferred_element_type=jnp.float32) + b3_ref[...]

    # Numerically stable log_softmax along features (row reduce -> XLU, exp/log -> EUP).
    m = jnp.max(logits, axis=-1, keepdims=True)
    shifted = logits - m
    lse = jnp.log(jnp.sum(jnp.exp(shifted), axis=-1, keepdims=True))
    o_ref[...] = (shifted - lse).astype(o_ref.dtype)


def prepare_params(w1, b1, w2, b2, w3, b3):
    """Pre-pad (once, outside the per-forward jit) all weights/biases to lane-dense shapes."""
    in_dim, h1_dim = w1.shape
    h2_dim = w2.shape[1]
    out_dim = w3.shape[1]

    d1 = _round_up(h1_dim, _LANE)
    d2 = _round_up(h2_dim, _LANE)
    d3 = _round_up(out_dim, _LANE)

    w1p = _pad_to(w1, (in_dim, d1))                       # K stays at in_dim (unpadded x)
    b1p = _pad_to(b1.reshape(1, -1), (1, d1))
    w2p = _pad_to(w2, (d1, d2))
    b2p = _pad_to(b2.reshape(1, -1), (1, d2))
    w3p = _pad_to(w3, (d2, d3))                           # padded columns are zero
    b3p = _pad_to(b3.reshape(1, -1), (1, d3), value=_NEG_BIG)  # padded logits -> exactly -1e30
    return (w1p, b1p, w2p, b2p, w3p, b3p), out_dim


@functools.partial(jax.jit, static_argnames=("out_dim", "block_batch"))
def fully_connected_nn(x, w1p, b1p, w2p, b2p, w3p, b3p, out_dim, block_batch=512):
    batch, in_dim = x.shape
    d1 = w1p.shape[1]
    d2 = w2p.shape[1]
    d3 = w3p.shape[1]

    # Batch tile: cap at block_batch, but aim for (at least) 2 balanced grid steps at small /
    # medium batch so both v7x TensorCores get work; always a multiple of the f32 sublane count.
    half = _round_up(max(pl.cdiv(batch, 2), 1), _SUBLANE)
    tb = max(_SUBLANE, min(block_batch, half))
    grid = pl.cdiv(batch, tb)

    out_padded = pl.pallas_call(
        _mlp_kernel,
        out_shape=jax.ShapeDtypeStruct((batch, d3), jnp.float32),
        grid_spec=pltpu.PrefetchScalarGridSpec(
            num_scalar_prefetch=0,
            grid=(grid,),
            in_specs=[
                pl.BlockSpec((tb, in_dim), lambda i: (i, 0)),   # x: streamed per batch tile (unpadded)
                pl.BlockSpec((in_dim, d1), lambda i: (0, 0)),   # w1: resident in VMEM
                pl.BlockSpec((1, d1), lambda i: (0, 0)),        # b1: resident
                pl.BlockSpec((d1, d2), lambda i: (0, 0)),       # w2: resident
                pl.BlockSpec((1, d2), lambda i: (0, 0)),        # b2: resident
                pl.BlockSpec((d2, d3), lambda i: (0, 0)),       # w3: resident
                pl.BlockSpec((1, d3), lambda i: (0, 0)),        # b3: resident (-1e30 padded cols)
            ],
            out_specs=pl.BlockSpec((tb, d3), lambda i: (i, 0)),
        ),
        compiler_params=pltpu.CompilerParams(
            dimension_semantics=("parallel",),
            vmem_limit_bytes=32 * 1024 * 1024,  # actual use << 4 MiB even at tb=512
        ),
    )(x, w1p, b1p, w2p, b2p, w3p, b3p)

    # Drop lane padding (padded columns hold ~-1e30 and are never real classes).
    return out_padded[:, :out_dim]


def _init_linear(key, fan_in, fan_out):
    """PyTorch-style uniform(-1/sqrt(fan_in), 1/sqrt(fan_in)); W returned as (fan_in, fan_out)."""
    kw, kb = jax.random.split(key)
    bound = 1.0 / jnp.sqrt(jnp.float32(fan_in))
    w = jax.random.uniform(kw, (fan_in, fan_out), jnp.float32, -bound, bound)
    b = jax.random.uniform(kb, (fan_out,), jnp.float32, -bound, bound)
    return w, b


def _reference(x, w1, b1, w2, b2, w3, b3):
    h1 = jax.nn.relu(x @ w1 + b1)
    h2 = jax.nn.relu(h1 @ w2 + b2)
    logits = h2 @ w3 + b3
    return jax.nn.log_softmax(logits, axis=1)


if __name__ == "__main__":
    input_number = 100
    output_number = 10

    key = jax.random.PRNGKey(0)
    kx, k1, k2, k3, kx_big = jax.random.split(key, 5)

    w1, b1 = _init_linear(k1, input_number, 20)
    w2, b2 = _init_linear(k2, 20, 200)
    w3, b3 = _init_linear(k3, 200, output_number)

    # Pre-pad parameters once (outside the per-forward path).
    (w1p, b1p, w2p, b2p, w3p, b3p), out_dim = prepare_params(w1, b1, w2, b2, w3, b3)

    # Small-batch case (matches the module's typical usage).
    batch = 2
    x = jax.random.normal(kx, (batch, input_number), jnp.float32)
    out = jax.block_until_ready(
        fully_connected_nn(x, w1p, b1p, w2p, b2p, w3p, b3p, out_dim=out_dim))
    ref = _reference(x, w1, b1, w2, b2, w3, b3)
    assert out.shape == (batch, output_number)
    assert jnp.allclose(out, ref, atol=1e-5, rtol=1e-5), "mismatch vs reference (batch=2)"

    # Larger batch to exercise the multi-step batch grid / partial final tile.
    big_batch = 300
    xb = jax.random.normal(kx_big, (big_batch, input_number), jnp.float32)
    out_b = jax.block_until_ready(
        fully_connected_nn(xb, w1p, b1p, w2p, b2p, w3p, b3p, out_dim=out_dim))
    ref_b = _reference(xb, w1, b1, w2, b2, w3, b3)
    assert out_b.shape == (big_batch, output_number)
    assert jnp.allclose(out_b, ref_b, atol=1e-5, rtol=1e-5), "mismatch vs reference (batch=300)"

    print("KERNEL_OK")
</pallas_src>

<mosaic_0001>
module attributes {stable_mosaic.version = 11 : i64} {
  func.func @_mlp_kernel(%arg0: i32, %arg1: memref<8x100xf32, #tpu.memory_space<vmem>>, %arg2: memref<100x128xf32, #tpu.memory_space<vmem>>, %arg3: memref<1x128xf32, #tpu.memory_space<vmem>>, %arg4: memref<128x256xf32, #tpu.memory_space<vmem>>, %arg5: memref<1x256xf32, #tpu.memory_space<vmem>>, %arg6: memref<256x128xf32, #tpu.memory_space<vmem>>, %arg7: memref<1x128xf32, #tpu.memory_space<vmem>>, %arg8: memref<8x128xf32, #tpu.memory_space<vmem>>) attributes {dimension_semantics = [#tpu.dimension_semantics<parallel>], iteration_bounds = array<i64: 1>, scalar_prefetch = 0 : i64, scratch_operands = 0 : i64, tpu.core_type = #tpu.core_type<tc>, window_params = [{transform_indices = @transform_0, window_bounds = array<i64: 8, 100>}, {pipeline_mode = #tpu.pipeline_mode<synchronous>, transform_indices = @transform_1, window_bounds = array<i64: 100, 128>}, {pipeline_mode = #tpu.pipeline_mode<synchronous>, transform_indices = @transform_2, window_bounds = array<i64: 1, 128>}, {pipeline_mode = #tpu.pipeline_mode<synchronous>, transform_indices = @transform_3, window_bounds = array<i64: 128, 256>}, {pipeline_mode = #tpu.pipeline_mode<synchronous>, transform_indices = @transform_4, window_bounds = array<i64: 1, 256>}, {pipeline_mode = #tpu.pipeline_mode<synchronous>, transform_indices = @transform_5, window_bounds = array<i64: 256, 128>}, {pipeline_mode = #tpu.pipeline_mode<synchronous>, transform_indices = @transform_6, window_bounds = array<i64: 1, 128>}, {transform_indices = @transform_7, window_bounds = array<i64: 8, 128>}]} {
    %c0 = arith.constant 0 : index
    %c0_0 = arith.constant 0 : index
    %0 = vector.load %arg1[%c0, %c0_0] : memref<8x100xf32, #tpu.memory_space<vmem>>, vector<8x100xf32>
    %c0_1 = arith.constant 0 : index
    %c0_2 = arith.constant 0 : index
    %1 = vector.load %arg2[%c0_1, %c0_2] : memref<100x128xf32, #tpu.memory_space<vmem>>, vector<100x128xf32>
    %cst = arith.constant dense<0.000000e+00> : vector<8x128xf32>
    %2 = tpu.matmul %0, %1, %cst {dimension_numbers = #tpu.dot_dimension_numbers<[1], [0], [0], [1], [0, 0, 1, 1], [], []>} : vector<8x100xf32>, vector<100x128xf32>, vector<8x128xf32> -> vector<8x128xf32>
    %c0_3 = arith.constant 0 : index
    %c0_4 = arith.constant 0 : index
    %3 = vector.load %arg3[%c0_3, %c0_4] : memref<1x128xf32, #tpu.memory_space<vmem>>, vector<1x128xf32>
    %4 = vector.broadcast %3 : vector<1x128xf32> to vector<8x128xf32>
    %5 = arith.addf %2, %4 : vector<8x128xf32>
    %cst_5 = arith.constant 0.000000e+00 : f32
    %6 = vector.broadcast %cst_5 : f32 to vector<8x128xf32>
    %7 = arith.maximumf %5, %6 : vector<8x128xf32>
    %c0_6 = arith.constant 0 : index
    %c0_7 = arith.constant 0 : index
    %8 = vector.load %arg4[%c0_6, %c0_7] : memref<128x256xf32, #tpu.memory_space<vmem>>, vector<128x256xf32>
    %cst_8 = arith.constant dense<0.000000e+00> : vector<8x256xf32>
    %9 = tpu.matmul %7, %8, %cst_8 {dimension_numbers = #tpu.dot_dimension_numbers<[1], [0], [0], [1], [0, 0, 1, 1], [], []>} : vector<8x128xf32>, vector<128x256xf32>, vector<8x256xf32> -> vector<8x256xf32>
    %c0_9 = arith.constant 0 : index
    %c0_10 = arith.constant 0 : index
    %10 = vector.load %arg5[%c0_9, %c0_10] : memref<1x256xf32, #tpu.memory_space<vmem>>, vector<1x256xf32>
    %11 = vector.broadcast %10 : vector<1x256xf32> to vector<8x256xf32>
    %12 = arith.addf %9, %11 : vector<8x256xf32>
    %cst_11 = arith.constant 0.000000e+00 : f32
    %13 = vector.broadcast %cst_11 : f32 to vector<8x256xf32>
    %14 = arith.maximumf %12, %13 : vector<8x256xf32>
    %c0_12 = arith.constant 0 : index
    %c0_13 = arith.constant 0 : index
    %15 = vector.load %arg6[%c0_12, %c0_13] : memref<256x128xf32, #tpu.memory_space<vmem>>, vector<256x128xf32>
    %cst_14 = arith.constant dense<0.000000e+00> : vector<8x128xf32>
    %16 = tpu.matmul %14, %15, %cst_14 {dimension_numbers = #tpu.dot_dimension_numbers<[1], [0], [0], [1], [0, 0, 1, 1], [], []>} : vector<8x256xf32>, vector<256x128xf32>, vector<8x128xf32> -> vector<8x128xf32>
    %c0_15 = arith.constant 0 : index
    %c0_16 = arith.constant 0 : index
    %17 = vector.load %arg7[%c0_15, %c0_16] : memref<1x128xf32, #tpu.memory_space<vmem>>, vector<1x128xf32>
    %18 = vector.broadcast %17 : vector<1x128xf32> to vector<8x128xf32>
    %19 = arith.addf %16, %18 : vector<8x128xf32>
    %cst_17 = arith.constant dense<0xFF800000> : vector<8xf32>
    %20 = vector.multi_reduction <maximumf>, %19, %cst_17 [1] : vector<8x128xf32> to vector<8xf32>
    %21 = vector.shape_cast %20 : vector<8xf32> to vector<8x1xf32>
    %22 = vector.broadcast %21 : vector<8x1xf32> to vector<8x128xf32>
    %23 = arith.subf %19, %22 : vector<8x128xf32>
    %24 = math.exp %23 : vector<8x128xf32>
    %cst_18 = arith.constant dense<0.000000e+00> : vector<8xf32>
    %25 = vector.multi_reduction <add>, %24, %cst_18 [1] : vector<8x128xf32> to vector<8xf32>
    %26 = vector.shape_cast %25 : vector<8xf32> to vector<8x1xf32>
    %27 = math.log %26 : vector<8x1xf32>
    %28 = vector.broadcast %27 : vector<8x1xf32> to vector<8x128xf32>
    %29 = arith.subf %23, %28 : vector<8x128xf32>
    %c0_19 = arith.constant 0 : index
    %c0_20 = arith.constant 0 : index
    %30 = vector.load %arg8[%c0_19, %c0_20] : memref<8x128xf32, #tpu.memory_space<vmem>>, vector<8x128xf32>
    tpu.vector_store %arg8[%c0_19, %c0_20], %29 {strides = array<i32>} : memref<8x128xf32, #tpu.memory_space<vmem>>, vector<8x128xf32>,
    return
  }
  func.func @transform_0(%arg0: i32) -> (i32, i32) {
    %c0_i32 = arith.constant 0 : i32
    %c0_i32_0 = arith.constant 0 : i32
    return %arg0, %c0_i32 : i32, i32
  }
  func.func @transform_1(%arg0: i32) -> (i32, i32) {
    %c0_i32 = arith.constant 0 : i32
    %c0_i32_0 = arith.constant 0 : i32
    %c0_i32_1 = arith.constant 0 : i32
    return %c0_i32, %c0_i32_0 : i32, i32
  }
  func.func @transform_2(%arg0: i32) -> (i32, i32) {
    %c0_i32 = arith.constant 0 : i32
    %c0_i32_0 = arith.constant 0 : i32
    %c0_i32_1 = arith.constant 0 : i32
    return %c0_i32, %c0_i32_0 : i32, i32
  }
  func.func @transform_3(%arg0: i32) -> (i32, i32) {
    %c0_i32 = arith.constant 0 : i32
    %c0_i32_0 = arith.constant 0 : i32
    %c0_i32_1 = arith.constant 0 : i32
    return %c0_i32, %c0_i32_0 : i32, i32
  }
  func.func @transform_4(%arg0: i32) -> (i32, i32) {
    %c0_i32 = arith.constant 0 : i32
    %c0_i32_0 = arith.constant 0 : i32
    %c0_i32_1 = arith.constant 0 : i32
    return %c0_i32, %c0_i32_0 : i32, i32
  }
  func.func @transform_5(%arg0: i32) -> (i32, i32) {
    %c0_i32 = arith.constant 0 : i32
    %c0_i32_0 = arith.constant 0 : i32
    %c0_i32_1 = arith.constant 0 : i32
    return %c0_i32, %c0_i32_0 : i32, i32
  }
  func.func @transform_6(%arg0: i32) -> (i32, i32) {
    %c0_i32 = arith.constant 0 : i32
    %c0_i32_0 = arith.constant 0 : i32
    %c0_i32_1 = arith.constant 0 : i32
    return %c0_i32, %c0_i32_0 : i32, i32
  }
  func.func @transform_7(%arg0: i32) -> (i32, i32) {
    %c0_i32 = arith.constant 0 : i32
    %c0_i32_0 = arith.constant 0 : i32
    return %arg0, %c0_i32 : i32, i32
  }
}

</mosaic_0001>

<bundles_post_ra>
// kernel: fully_connected_nn.1
= control target key start
LH: loop header
LB: loop body
LE: loop exit
PB: predicated region body
PF: predicated region fallthrough
CT: control target
= control target key end

     0   :  { %12 = vsyncpa [#allocation3], 0  ;;  %s553_s0 = inlined_call_operand.hbm [shape: f32[2,100], index: 0, kind: input, shape index: {}]   ;;  %s554_s1 = inlined_call_operand.hbm [shape: f32[100,128], index: 1, kind: input, shape index: {}]   ;;  %s555_s2 = inlined_call_operand.vmem [shape: f32[1,128], index: 2, kind: input, shape index: {}]   ;;  %s556_s3 = inlined_call_operand.hbm [shape: f32[128,256], index: 3, kind: input, shape index: {}]   ;;  %s557_s4 = inlined_call_operand.vmem [shape: f32[1,256], index: 4, kind: input, shape index: {}]   ;;  %s558_s5 = inlined_call_operand.hbm [shape: f32[256,128], index: 5, kind: input, shape index: {}]   ;;  %s559_s6 = inlined_call_operand.vmem [shape: f32[1,128], index: 6, kind: input, shape index: {}]   ;;  %s560_s7 = inlined_call_operand.hbm [shape: f32[2,128], index: 7, kind: output, shape index: {}]  }
   0x1   :  { %13 = vsyncpa [#allocation6], 0 }
   0x2   :  { %14 = vsyncpa [#allocation9], 0 }
   0x3   :  { %15 = vsyncpa [#allocation4], 0  ;;  %s33_s26 = sshll.u32 %s554_s1, 4  ;;  %s34_s26 = int_to_ptr.hbm [resolvable:$true] %s33_s26 }
   0x4   :  { %19 = vsyncadd [#allocation3], 96  ;;  %s472_s27 = smov [#allocation5]   ;;  %s20_s8 = sshll.u32 %s553_s0, 4  ;;  %s21_s8 = int_to_ptr.hbm [resolvable:$true] %s20_s8 }
   0x5   :  { %s35_s28 = sshll.u32 %s472_s27, 4  ;;  %s473_s9 = smov 128   ;;  %s36_s28 = int_to_ptr.vmem [resolvable:$true] %s35_s28 }
   0x6   :  { %s474_s10 = smov 8   ;;  %s475_s11 = smov [#allocation2]  }
   0x7   :  { %41 = dma.hbm_to_vmem [thread:$0]  %s34_s26, 1664, %s36_s28, [#allocation6], %s473_s9, %s473_s9, %s474_s10  }
   0x8   :  { %s22_s12 = sshll.u32 %s475_s11, 4  ;;  %s476_s13 = smov 32   ;;  %s23_s12 = int_to_ptr.vmem [resolvable:$true] %s22_s12 }
   0x9   :  { %s477_s14 = smov 2   ;;  %s48_s16 = sshll.u32 %s556_s3, 4  ;;  %s49_s16 = int_to_ptr.hbm [resolvable:$true] %s48_s16 }
   0xa   :  { %28 = dma.hbm_to_vmem [thread:$0]  %s21_s8, 32, %s23_s12, [#allocation3], %s476_s13, %s476_s13, %s477_s14  }
   0xb   :  { %s478_s17 = smov [#allocation7]   ;;  %s63_s20 = sshll.u32 %s558_s5, 4  ;;  %s64_s20 = int_to_ptr.hbm [resolvable:$true] %s63_s20 }
   0xc   :  { %s50_s0 = sshll.u32 %s478_s17, 4  ;;  %s479_s21 = smov 256   ;;  %s51_s0 = int_to_ptr.vmem [resolvable:$true] %s50_s0 }
   0xd   :  { %s480_s22 = smov 16   ;;  %s481_s23 = smov [#allocation8]  }
   0xe   :  { %56 = dma.hbm_to_vmem [thread:$0]  %s49_s16, 4096, %s51_s0, [#allocation6], %s479_s21, %s479_s21, %s480_s22  }
   0xf   :  { %s65_s24 = sshll.u32 %s481_s23, 4  ;;  %s66_s24 = int_to_ptr.vmem [resolvable:$true] %s65_s24 }
  0x10   :  { %71 = dma.hbm_to_vmem [thread:$0]  %s64_s20, 4096, %s66_s24, [#allocation9], %s473_s9, %s473_s9, %s474_s10  }
  0x11   :  { %464 = dma.done.wait [#allocation3], 128  }
  0x12   :  { %465 = vsyncadd [#allocation3], 4294967168 }
  0x13   :  { %466 = dma.done.wait [#allocation6], 5760  }
  0x14   :  { %467 = vsyncadd [#allocation6], 4294961536 }
  0x15   :  { %468 = dma.done.wait [#allocation9], 4096  }
  0x16   :  { %469 = vsyncadd [#allocation9], 4294963200  ;;  %vm112_vm0 = vcmask 1043456   ;;  %v103_v0 = vld [vmem:[#allocation5 + $0x60] sm:$0xf]  ;;  %v102_v1 = vld [vmem:[#allocation5 + $0x58] sm:$0xff] }
  0x17   :  { %325 = vmatpush.msk.msra.mxu0 %vm112_vm0, %v103_v0  ;;  %v101_v2 = vld [vmem:[#allocation5 + $0x50] sm:$0xff]  ;;  %v100_v3 = vld [vmem:[#allocation5 + $0x48] sm:$0xff]  ;;  %v167_v4 = vld [vmem:[#allocation7 + $0xf0] sm:$0xff]  ;;  %vm108_vm1 = vcmask 818176  }
  0x18   :  { %175 = vmatpush.msra.mxu1 %v167_v4  ;;  %v168_v5 = vld [vmem:[#allocation7 + $0xf8] sm:$0xff]  ;;  %v165_v6 = vld [vmem:[#allocation7 + $0xe0] sm:$0xff]  ;;  %v166_v7 = vld [vmem:[#allocation7 + $0xe8] sm:$0xff] }
  0x19   :  { %120 = vmatpush.msra.mxu0 %v102_v1  ;;  %v99_v8 = vld [vmem:[#allocation5 + $0x40] sm:$0xff]  ;;  %195 = vmatpush.msra.mxu2 %v168_v5  ;;  %v163_v9 = vld [vmem:[#allocation7 + $0xd0] sm:$0xff]  ;;  %v161_v12 = vld [vmem:[#allocation7 + $0xc0] sm:$0xff] }
  0x1a   :  { %176 = vmatpush.msra.mxu1 %v165_v6  ;;  %v164_v10 = vld [vmem:[#allocation7 + $0xd8] sm:$0xff]  ;;  %v98_v11 = vld [vmem:[#allocation5 + $0x38] sm:$0xff]  ;;  %v162_v13 = vld [vmem:[#allocation7 + $0xc8] sm:$0xff] }
  0x1b   :  { %121 = vmatpush.msra.mxu0 %v101_v2  ;;  %196 = vmatpush.msra.mxu2 %v166_v7  ;;  %v97_v14 = vld [vmem:[#allocation5 + $0x30] sm:$0xff]  ;;  %v159_v15 = vld [vmem:[#allocation7 + $0xb0] sm:$0xff]  ;;  %v160_v16 = vld [vmem:[#allocation7 + $0xb8] sm:$0xff] }
  0x1c   :  { %177 = vmatpush.msra.mxu1 %v163_v9  ;;  %v96_v17 = vld [vmem:[#allocation5 + $0x28] sm:$0xff]  ;;  %v158_v19 = vld [vmem:[#allocation7 + $0xa8] sm:$0xff]  ;;  %v95_v20 = vld [vmem:[#allocation5 + $0x20] sm:$0xff] }
  0x1d   :  { %122 = vmatpush.msra.mxu0 %v100_v3  ;;  %197 = vmatpush.msra.mxu2 %v164_v10  ;;  %v157_v18 = vld [vmem:[#allocation7 + $0xa0] sm:$0xff]  ;;  %v155_v21 = vld [vmem:[#allocation7 + $0x90] sm:$0xff]  ;;  %v156_v22 = vld [vmem:[#allocation7 + $0x98] sm:$0xff] }
  0x1e   :  { %178 = vmatpush.msra.mxu1 %v161_v12  ;;  %v94_v23 = vld [vmem:[#allocation5 + $0x18] sm:$0xff]  ;;  %v153_v24 = vld [vmem:[#allocation7 + $0x80] sm:$0xff]  ;;  %v154_v25 = vld [vmem:[#allocation7 + $0x88] sm:$0xff] }
  0x1f   :  { %123 = vmatpush.msra.mxu0 %v99_v8  ;;  %198 = vmatpush.msra.mxu2 %v162_v13  ;;  %v93_v26 = vld [vmem:[#allocation5 + $0x10] sm:$0xff]  ;;  %v151_v27 = vld [vmem:[#allocation7 + $0x70] sm:$0xff]  ;;  %v152_v28 = vld [vmem:[#allocation7 + $0x78] sm:$0xff] }
  0x20   :  { %179 = vmatpush.msra.mxu1 %v159_v15  ;;  %v92_v29 = vld [vmem:[#allocation5 + $0x8] sm:$0xff]  ;;  %v150_v31 = vld [vmem:[#allocation7 + $0x68] sm:$0xff]  ;;  %v91_v32 = vld [vmem:[#allocation5] sm:$0xff] }
  0x21   :  { %124 = vmatpush.msra.mxu0 %v98_v11  ;;  %199 = vmatpush.msra.mxu2 %v160_v16  ;;  %v149_v30 = vld [vmem:[#allocation7 + $0x60] sm:$0xff]  ;;  %v147_v33 = vld [vmem:[#allocation7 + $0x50] sm:$0xff]  ;;  %v148_v35 = vld [vmem:[#allocation7 + $0x58] sm:$0xff] }
  0x22   :  { %180 = vmatpush.msra.mxu1 %v157_v18  ;;  %v90_v34 = vld [vmem:[#allocation2] sm:$0xff]  ;;  %v145_v36 = vld [vmem:[#allocation7 + $0x40] sm:$0xff]  ;;  %v146_v37 = vld [vmem:[#allocation7 + $0x48] sm:$0xff] }
  0x23   :  { %125 = vmatpush.msra.mxu0 %v97_v14  ;;  %200 = vmatpush.msra.mxu2 %v158_v19  ;;  %v143_v38 = vld [vmem:[#allocation7 + $0x30] sm:$0xff]  ;;  %v144_v39 = vld [vmem:[#allocation7 + $0x38] sm:$0xff]  ;;  %v141_v40 = vld [vmem:[#allocation7 + $0x20] sm:$0xff] }
  0x24   :  { %181 = vmatpush.msra.mxu1 %v155_v21  ;;  %v142_v41 = vld [vmem:[#allocation7 + $0x28] sm:$0xff]  ;;  %v139_v42 = vld [vmem:[#allocation7 + $0x10] sm:$0xff]  ;;  %v140_v43 = vld [vmem:[#allocation7 + $0x18] sm:$0xff] }
  0x25   :  { %126 = vmatpush.msra.mxu0 %v96_v17  ;;  %201 = vmatpush.msra.mxu2 %v156_v22  ;;  %v137_v44 = vld [vmem:[#allocation7] sm:$0xff]  ;;  %v138_v45 = vld [vmem:[#allocation7 + $0x8] sm:$0xff]  ;;  %v232_v46 = vld [vmem:[#allocation8 + $0x78] sm:$0xff] }
  0x26   :  { %182 = vmatpush.msra.mxu1 %v153_v24  ;;  %v231_v47 = vld [vmem:[#allocation8 + $0x70] sm:$0xff]  ;;  %253 = vmatpush.msra.mxu3 %v232_v46  ;;  %v248_v48 = vld [vmem:[#allocation8 + $0xf8] sm:$0xff]  ;;  %v230_v49 = vld [vmem:[#allocation8 + $0x68] sm:$0xff] }
  0x27   :  { %127 = vmatpush.msra.mxu0 %v95_v20  ;;  %202 = vmatpush.msra.mxu2 %v154_v25  ;;  %v247_v50 = vld [vmem:[#allocation8 + $0xf0] sm:$0xff]  ;;  %v246_v51 = vld [vmem:[#allocation8 + $0xe8] sm:$0xff]  ;;  %v229_v52 = vld [vmem:[#allocation8 + $0x60] sm:$0xff] }
  0x28   :  { %183 = vmatpush.msra.mxu1 %v151_v27  ;;  %254 = vmatpush.msra.mxu3 %v231_v47  ;;  %v245_v53 = vld [vmem:[#allocation8 + $0xe0] sm:$0xff]  ;;  %v228_v54 = vld [vmem:[#allocation8 + $0x58] sm:$0xff]  ;;  %v227_v56 = vld [vmem:[#allocation8 + $0x50] sm:$0xff] }
  0x29   :  { %128 = vmatpush.msra.mxu0 %v94_v23  ;;  %203 = vmatpush.msra.mxu2 %v152_v28  ;;  %v244_v55 = vld [vmem:[#allocation8 + $0xd8] sm:$0xff]  ;;  %v243_v57 = vld [vmem:[#allocation8 + $0xd0] sm:$0xff]  ;;  %v226_v58 = vld [vmem:[#allocation8 + $0x48] sm:$0xff] }
  0x2a   :  { %184 = vmatpush.msra.mxu1 %v149_v30  ;;  %255 = vmatpush.msra.mxu3 %v230_v49  ;;  %v242_v59 = vld [vmem:[#allocation8 + $0xc8] sm:$0xff]  ;;  %v225_v60 = vld [vmem:[#allocation8 + $0x40] sm:$0xff]  ;;  %v224_v62 = vld [vmem:[#allocation8 + $0x38] sm:$0xff] }
  0x2b   :  { %129 = vmatpush.msra.mxu0 %v93_v26  ;;  %204 = vmatpush.msra.mxu2 %v150_v31  ;;  %v241_v61 = vld [vmem:[#allocation8 + $0xc0] sm:$0xff]  ;;  %v240_v63 = vld [vmem:[#allocation8 + $0xb8] sm:$0xff]  ;;  %v223_v0 = vld [vmem:[#allocation8 + $0x30] sm:$0xff] }
  0x2c   :  { %185 = vmatpush.msra.mxu1 %v147_v33  ;;  %256 = vmatpush.msra.mxu3 %v229_v52  ;;  %v239_v1 = vld [vmem:[#allocation8 + $0xb0] sm:$0xff]  ;;  %v222_v2 = vld [vmem:[#allocation8 + $0x28] sm:$0xff]  ;;  %v221_v3 = vld [vmem:[#allocation8 + $0x20] sm:$0xff] }
  0x2d   :  { %130 = vmatpush.msra.mxu0 %v92_v29  ;;  %205 = vmatpush.msra.mxu2 %v148_v35  ;;  %v220_v4 = vld [vmem:[#allocation8 + $0x18] sm:$0xff]  ;;  %v338_v5 = vld [vmem:[%s555_s2] ss:$0 sm:$0xff]  ;;  %v238_v10 = vld [vmem:[#allocation8 + $0xa8] sm:$0xff] }
  0x2e   :  { %186 = vmatpush.msra.mxu1 %v145_v36  ;;  %257 = vmatpush.msra.mxu3 %v228_v54  ;;  %v219_v9 = vld [vmem:[#allocation8 + $0x10] sm:$0xff]  ;;  %v218_v11 = vld [vmem:[#allocation8 + $0x8] sm:$0xff]  ;;  %v237_v12 = vld [vmem:[#allocation8 + $0xa0] sm:$0xff] }
  0x2f   :  { %131 = vmatpush.msra.mxu0 %v91_v32  ;;  %206 = vmatpush.msra.mxu2 %v146_v37  ;;  %v217_v13 = vld [vmem:[#allocation8] sm:$0xff]  ;;  %v236_v14 = vld [vmem:[#allocation8 + $0x98] sm:$0xff]  ;;  %v235_v15 = vld [vmem:[#allocation8 + $0x90] sm:$0xff] }
  0x30   :  { %326 = vmatmul.msk.f32.vlgmr.msra.gmra.mxu0 %vm108_vm1, %v90_v34  ;;  %187 = vmatpush.msra.mxu1 %v143_v38  ;;  %v234_v16 = vld [vmem:[#allocation8 + $0x88] sm:$0xff]  ;;  %v233_v17 = vld [vmem:[#allocation8 + $0x80] sm:$0xff]  ;;  %v169_v18 = vld [vmem:[%s557_s4] sm:$0x3] }
  0x31   :  { %207 = vmatpush.msra.mxu2 %v144_v39  ;;  %273 = vmatpush.msrb.mxu0 %v248_v48  ;;  %v171_v19 = vperm.slane %v169_v18, 0  ;;  %v172_v23 = vperm.slane %v169_v18, 1  ;;  %v339_v27 = vld [vmem:[%s559_s6] ss:$0 sm:$0xff] }
  0x32   :  { %188 = vmatpush.msra.mxu1 %v141_v40  ;;  %258 = vmatpush.msra.mxu3 %v227_v56 }
  0x33   :  { %208 = vmatpush.msra.mxu2 %v142_v41  ;;  %274 = vmatpush.msrb.mxu0 %v247_v50 }
  0x34   :  { %189 = vmatpush.msra.mxu1 %v139_v42  ;;  %259 = vmatpush.msra.mxu3 %v226_v58 }
  0x35   :  { %209 = vmatpush.msra.mxu2 %v140_v43  ;;  %275 = vmatpush.msrb.mxu0 %v246_v51 }
  0x36   :  { %190 = vmatpush.msra.mxu1 %v137_v44  ;;  %260 = vmatpush.msra.mxu3 %v225_v60 }
  0x37   :  { %210 = vmatpush.msra.mxu2 %v138_v45  ;;  %276 = vmatpush.msrb.mxu0 %v245_v53 }
  0x38   :  { %261 = vmatpush.msra.mxu3 %v224_v62 }
  0x39   :  { %277 = vmatpush.msrb.mxu0 %v244_v55 }
  0x3a   :  { %262 = vmatpush.msra.mxu3 %v223_v0 }
  0x3b   :  { %278 = vmatpush.msrb.mxu0 %v243_v57 }
  0x3c   :  { %263 = vmatpush.msra.mxu3 %v222_v2 }
  0x3d   :  { %279 = vmatpush.msrb.mxu0 %v242_v59 }
  0x3e   :  { %264 = vmatpush.msra.mxu3 %v221_v3 }
  0x3f   :  { %280 = vmatpush.msrb.mxu0 %v241_v61 }
  0x40   :  { %265 = vmatpush.msra.mxu3 %v220_v4 }
  0x41   :  { %281 = vmatpush.msrb.mxu0 %v240_v63 }
  0x42   :  { %266 = vmatpush.msra.mxu3 %v219_v9 }
  0x43   :  { %282 = vmatpush.msrb.mxu0 %v239_v1 }
  0x44   :  { %267 = vmatpush.msra.mxu3 %v218_v11 }
  0x45   :  { %283 = vmatpush.msrb.mxu0 %v238_v10 }
  0x46   :  { %268 = vmatpush.msra.mxu3 %v217_v13 }
  0x47   :  { %284 = vmatpush.msrb.mxu0 %v237_v12 }
  0x49   :  { %285 = vmatpush.msrb.mxu0 %v236_v14 }
  0x4b   :  { %286 = vmatpush.msrb.mxu0 %v235_v15 }
  0x4d   :  { %287 = vmatpush.msrb.mxu0 %v234_v16 }
  0x4f   :  { %288 = vmatpush.msrb.mxu0 %v233_v17 }
  0xad   :  { %v133_v6 = vpop.f32.mrf.mxu0 }
  0xae   :  { %v134_v7 = vadd.f32 %v338_v5, %v133_v6 }
  0xb0   :  { %v136_v8 = vmax.f32 %v134_v7, 0.0 }
  0xb2   :  { %191 = vmatmul.f32.vlgmr.msra.gmra.mxu1 %v136_v8  ;;  %211 = vmatmul.f32.vlgmr.msra.gmra.mxu2 %v136_v8 }
 0x12f   :  { %v192_v20 = vpop.f32.mrf.mxu1 }
 0x130   :  { %v193_v21 = vadd.f32 %v192_v20, %v171_v19 }
 0x132   :  { %v215_v22 = vmax.f32 %v193_v21, 0.0 }
 0x134   :  { %269 = vmatmul.f32.vlgmr.msra.gmra.mxu3 %v215_v22 }
 0x135   :  { %v212_v24 = vpop.f32.mrf.mxu2 }
 0x136   :  { %v213_v25 = vadd.f32 %v212_v24, %v172_v23 }
 0x138   :  { %v216_v26 = vmax.f32 %v213_v25, 0.0 }
 0x13a   :  { %289 = vmatmul.f32.vlgmr.msrb.gmra.mxu0 %v216_v26 }
 0x1b7   :  { %v270_v28 = vpop.f32.mrf.mxu3  ;;  %v290_v30 = vpop.f32.mrf.mxu0 }
 0x1b8   :  { %v271_v29 = vadd.f32 %v339_v27, %v270_v28 }
 0x1ba   :  { %v291_v31 = vadd.f32 %v290_v30, %v271_v29 }
 0x1bc   :  { %293 = vmax.xlane.f32.xlu0 %v291_v31 }
 0x22f   :  { %v294_v32 = vpop.xlane.xlu0 %293 }
 0x230   :  { %v295_v33 = vsub.f32 %v291_v31, %v294_v32 }
 0x232   :  { %v296_v34 = vmul.f32 1.442695, %v295_v33 }
 0x234   :  { %340 = vpow2.f32 %v296_v34 }
 0x23a   :  { %v341_v35 = vpop.eup %340 }
 0x23b   :  { %298 = vadd.xlane.f32.xlu0 %v341_v35 }
 0x2ae   :  { %v299_v36 = vpop.xlane.xlu0 %298 }
 0x2af   :  { %342 = vlog2.f32 %v299_v36 }
 0x2b5   :  { %v343_v37 = vpop.eup %342 }
 0x2b6   :  { %v301_v38 = vmul.f32 0.6931472, %v343_v37 }
 0x2b8   :  { %v302_v39 = vsub.f32 %v295_v33, %v301_v38 }
 0x2ba   :  { %303 = vst [vmem:[#allocation10] sm:$0xff] %v302_v39 }
 0x2bb   :  { %307 = vsyncadd [#allocation4], 96  ;;  %s310_s28 = sshll.u32 %s560_s7, 4  ;;  %s482_s29 = smov [#allocation10]   ;;  %s311_s28 = int_to_ptr.hbm [resolvable:$true] %s310_s28 }
 0x2bc   :  { %s308_s30 = sshll.u32 %s482_s29, 4  ;;  %s309_s30 = int_to_ptr.vmem [resolvable:$true] %s308_s30 }
 0x2bd   :  { %316 = dma.vmem_to_hbm [thread:$0]  %s309_s30, 32, %s311_s28, [#allocation4], %s476_s13, %s476_s13, %s477_s14  }
 0x2be   :  { %470 = dma.done.wait [#allocation4], 128  }
 0x2bf   :  { %471 = vsyncadd [#allocation4], 4294967168 }
 0x2c0   :  { %321 = vsyncpa [#allocation3], 1 }
 0x2c1   :  { %322 = vsyncpa [#allocation6], 1 }
 0x2c2   :  { %323 = vsyncpa [#allocation9], 1 }
 0x2c3   :  { %324 = vsyncpa [#allocation4], 1 }

</bundles_post_ra>
